<compile_context>
chip_gen: v5e
topology: v5e:2x2
jax: 0.10.0
libtpu: 0.0.40
codegen_flags: <defaults>
</compile_context>

<pallas_src>
import math

import jax
import jax.numpy as jnp
from jax import lax
from jax.experimental import pallas as pl
from jax.experimental.pallas import tpu as pltpu


# -----------------------------------------------------------------------------
# Counter-based uniform noise: murmur3 finalizer over absolute element indices.
# Pure int32 jnp ops -> bitwise-identical inside the Pallas kernel and in plain
# JAX (used by the reference), independent of grid tiling.
# -----------------------------------------------------------------------------
def _lsr(x, k):
    """Logical right shift for int32: arithmetic shift then mask off sign extension."""
    return jnp.bitwise_and(jnp.right_shift(x, k), (1 << (32 - k)) - 1)


def _mix32(x):
    x = jnp.bitwise_xor(x, _lsr(x, 16))
    x = x * (-2048144789)            # 0x85ebca6b (int32 wraparound is intended)
    x = jnp.bitwise_xor(x, _lsr(x, 13))
    x = x * (-1028477387)            # 0xc2b2ae35
    x = jnp.bitwise_xor(x, _lsr(x, 16))
    return x


def _uniform_from_index(idx, seed):
    """idx: int32 (any shape), seed: int32 scalar -> U[0,1) float32 (23-bit resolution)."""
    h = _mix32(idx + seed * (-1640531527))      # 0x9e3779b9 golden-ratio stride
    return jnp.bitwise_and(h, 0x7FFFFF).astype(jnp.float32) * (1.0 / (1 << 23))


# -----------------------------------------------------------------------------
# Probabilistic weight statistics (tiny elementwise parameter setup, plain JAX).
# Matches the PyTorch module: p(-1)=1-pa-pb, p(0)=pa, p(+1)=pb.
# -----------------------------------------------------------------------------
def _weight_stats(alpha, betta):
    a = jnp.squeeze(alpha, -1)
    b = jnp.squeeze(betta, -1)
    pa = jax.nn.sigmoid(a)                  # P(w = 0)
    pb = jax.nn.sigmoid(b) * (1.0 - pa)     # P(w = +1)
    p0 = 1.0 - pa - pb                      # P(w = -1)
    mean_w = pb - p0                        # E[w]
    sigma_sq_w = (p0 + pb) - mean_w * mean_w  # E[w^2] - E[w]^2
    return mean_w, sigma_sq_w


def _im2col_nkm(x, kh, kw, stride, padding, dilation):
    """x: [N, C, H, W] -> patches [N, C*kh*kw, OH*OW] (K on sublanes, spatial on lanes).

    Emitted directly in the layout the kernel consumes: one fused XLA concatenate write
    of the 9x tensor, no later pad / transpose passes over it."""
    N, C, H, W = x.shape
    xp = jnp.pad(x, ((0, 0), (0, 0), (padding, padding), (padding, padding)))
    OH = (H + 2 * padding - dilation * (kh - 1) - 1) // stride + 1
    OW = (W + 2 * padding - dilation * (kw - 1) - 1) // stride + 1
    taps = []
    for i in range(kh):
        for j in range(kw):
            taps.append(xp[:, :,
                           i * dilation: i * dilation + stride * OH: stride,
                           j * dilation: j * dilation + stride * OW: stride])
    p = jnp.stack(taps, axis=2)                       # [N, C, kh*kw, OH, OW]
    # k = c*kh*kw + i*kw + j  -> matches weight.reshape(O, -1) for OIHW weights.
    return p.reshape(N, C * kh * kw, OH * OW), OH, OW


# -----------------------------------------------------------------------------
# Forward pass.
# -----------------------------------------------------------------------------
def my_new_conv2d_forward(x, alpha, betta, bias, seed, *,
                          stride=1, padding=0, dilation=1, groups=1):
    """Train-mode forward of MyNewConv2d.  x: [N, C, H, W] float32.  Returns out NCHW."""
    assert groups == 1  # TODO(synk): grouped conv not implemented (module default groups=1)
    O, C, kh, kw = alpha.shape[:4]
    N = x.shape[0]

    mean_w, sigma_sq_w = _weight_stats(alpha, betta)

    patches, OH, OW = _im2col_nkm(x, kh, kw, stride, padding, dilation)
    K = C * kh * kw
    OHW = OH * OW

    # Spatial tile: full extent when small (full-dim blocks are always layout-legal),
    # else a large multiple of 128 (per-tile VMEM is tiny, so bigger is better).
    MAX_TM = 4096
    tm = min(OHW, MAX_TM)
    grid = (N, pl.cdiv(OHW, tm))

    wm = mean_w.reshape(O, K)
    ws = sigma_sq_w.reshape(O, K)
    b_col = bias.reshape(O, 1)
    seed_arr = jnp.asarray(seed, dtype=jnp.int32).reshape((1,))

    def kernel(seed_ref, p_ref, wm_ref, ws_ref, b_ref, o_ref):
        # seed_ref: (1,)        int32 seed (SMEM, scalar prefetch)
        # p_ref:    (1, K, tm)  im2col patch tile (K on sublanes, spatial on lanes)
        # wm_ref:   (O, K)      ternary mean weights
        # ws_ref:   (O, K)      sigma^2 weights
        # b_ref:    (O, 1)      bias column
        # o_ref:    (1, O, tm)  output tile in (n, o, spatial) layout
        n = pl.program_id(0)
        jt = pl.program_id(1)

        p = p_ref[0]                                                   # (K, tm)
        m = jnp.dot(wm_ref[...], p, preferred_element_type=jnp.float32) + b_ref[...]
        z1 = jnp.dot(ws_ref[...], p * p, preferred_element_type=jnp.float32)
        v = jnp.sqrt(jnp.maximum(z1, 0.0))       # clamp tiny fp32-negative sigma^2

        # eps ~ U[0,1): hash of the absolute (n, o, spatial) element index -> no eps
        # stream to/from HBM, deterministic regardless of tile size / TC assignment,
        # and exactly regenerable (e.g. by a backward kernel) from the same seed.
        row = lax.broadcasted_iota(jnp.int32, (O, tm), 0)
        col = lax.broadcasted_iota(jnp.int32, (O, tm), 1) + jt * tm
        gidx = (n * O + row) * OHW + col
        eps = _uniform_from_index(gidx, seed_ref[0])

        o_ref[0] = (m + eps * v).astype(o_ref.dtype)

    out = pl.pallas_call(
        kernel,
        out_shape=jax.ShapeDtypeStruct((N, O, OHW), jnp.float32),
        grid_spec=pltpu.PrefetchScalarGridSpec(
            num_scalar_prefetch=1,       # seed -> SMEM; index_maps get it as trailing arg
            grid=grid,
            in_specs=[
                pl.BlockSpec((1, K, tm), lambda n, j, s: (n, 0, j)),   # patch tile
                pl.BlockSpec((O, K), lambda n, j, s: (0, 0)),          # mean weights
                pl.BlockSpec((O, K), lambda n, j, s: (0, 0)),          # sigma^2 weights
                pl.BlockSpec((O, 1), lambda n, j, s: (0, 0)),          # bias column
            ],
            out_specs=pl.BlockSpec((1, O, tm), lambda n, j, s: (n, 0, j)),
        ),
        compiler_params=pltpu.CompilerParams(
            dimension_semantics=("parallel", "parallel")),
    )(seed_arr, patches, wm, ws, b_col)

    # (N, O, OH*OW) -> (N, O, OH, OW): split of the last dim only, no transpose pass.
    return out.reshape(N, O, OH, OW)


# -----------------------------------------------------------------------------
# Pure-JAX reference (lax conv) using the *same* counter-based eps draws.
# -----------------------------------------------------------------------------
def _reference_forward(x, alpha, betta, bias, seed, *, stride, padding, dilation):
    mean_w, sigma_sq_w = _weight_stats(alpha, betta)
    dn = ("NCHW", "OIHW", "NCHW")
    m = lax.conv_general_dilated(
        x, mean_w, (stride, stride), [(padding, padding), (padding, padding)],
        rhs_dilation=(dilation, dilation), dimension_numbers=dn)
    m = m + bias[None, :, None, None]
    z1 = lax.conv_general_dilated(
        x * x, sigma_sq_w, (stride, stride), [(padding, padding), (padding, padding)],
        rhs_dilation=(dilation, dilation), dimension_numbers=dn)
    N, O, OH, OW = m.shape
    idx = jnp.arange(N * O * OH * OW, dtype=jnp.int32).reshape(N, O, OH * OW)
    eps = _uniform_from_index(idx, jnp.int32(seed)).reshape(N, O, OH, OW)
    return m + eps * jnp.sqrt(jnp.maximum(z1, 0.0)), eps


if __name__ == "__main__":
    # Module config: MyNewConv2d(in_channels=4, out_channels=8, kernel_size=3, padding=1)
    in_channels, out_channels, ksize = 4, 8, 3
    stride, padding, dilation = 1, 1, 1
    N, H, W = 2, 16, 16
    seed = 1234

    key = jax.random.PRNGKey(0)
    k_x, k_bias = jax.random.split(key, 2)

    # Deterministic parameter init matching reset_parameters():
    alpha = jnp.full((out_channels, in_channels, ksize, ksize, 1), -0.69314, jnp.float32)
    betta = jnp.zeros((out_channels, in_channels, ksize, ksize, 1), jnp.float32)
    fan_in = in_channels * ksize * ksize * 3          # prob_size has a trailing dim of 3
    bound = 1.0 / math.sqrt(fan_in)
    bias = jax.random.uniform(k_bias, (out_channels,), jnp.float32, -bound, bound)

    x = jax.random.normal(k_x, (N, in_channels, H, W), jnp.float32)

    fwd = jax.jit(my_new_conv2d_forward,
                  static_argnames=("stride", "padding", "dilation", "groups"))
    out = fwd(x, alpha, betta, bias, seed,
              stride=stride, padding=padding, dilation=dilation, groups=1)
    out = jax.block_until_ready(out)

    ref, eps = _reference_forward(x, alpha, betta, bias, seed,
                                  stride=stride, padding=padding, dilation=dilation)
    assert out.shape == (N, out_channels, H, W)
    assert bool(jnp.all((eps >= 0.0) & (eps < 1.0)))          # eps ~ U[0,1) like torch.rand
    max_err = float(jnp.max(jnp.abs(out - ref)))
    assert jnp.allclose(out, ref, rtol=1e-3, atol=1e-3), max_err

    print("KERNEL_OK")
</pallas_src>

<mosaic_0001>
module attributes {stable_mosaic.version = 11 : i64} {
  func.func @kernel(%arg0: i32, %arg1: i32, %arg2: memref<1xi32, #tpu.memory_space<smem>>, %arg3: memref<1x36x256xf32, #tpu.memory_space<vmem>>, %arg4: memref<8x36xf32, #tpu.memory_space<vmem>>, %arg5: memref<8x36xf32, #tpu.memory_space<vmem>>, %arg6: memref<8x1xf32, #tpu.memory_space<vmem>>, %arg7: memref<1x8x256xf32, #tpu.memory_space<vmem>>) attributes {dimension_semantics = [#tpu.dimension_semantics<parallel>, #tpu.dimension_semantics<parallel>], iteration_bounds = array<i64: 2, 1>, scalar_prefetch = 1 : i64, scratch_operands = 0 : i64, tpu.core_type = #tpu.core_type<tc>, window_params = [{transform_indices = @transform_0, window_bounds = array<i64: 1, 36, 256>}, {pipeline_mode = #tpu.pipeline_mode<synchronous>, transform_indices = @transform_1, window_bounds = array<i64: 8, 36>}, {pipeline_mode = #tpu.pipeline_mode<synchronous>, transform_indices = @transform_2, window_bounds = array<i64: 8, 36>}, {pipeline_mode = #tpu.pipeline_mode<synchronous>, transform_indices = @transform_3, window_bounds = array<i64: 8, 1>}, {transform_indices = @transform_4, window_bounds = array<i64: 1, 8, 256>}]} {
    %c0 = arith.constant 0 : index
    %c0_0 = arith.constant 0 : index
    %c0_1 = arith.constant 0 : index
    %0 = vector.load %arg3[%c0, %c0_0, %c0_1] : memref<1x36x256xf32, #tpu.memory_space<vmem>>, vector<1x36x256xf32>
    %1 = vector.shape_cast %0 : vector<1x36x256xf32> to vector<36x256xf32>
    %c0_2 = arith.constant 0 : index
    %c0_3 = arith.constant 0 : index
    %2 = vector.load %arg4[%c0_2, %c0_3] : memref<8x36xf32, #tpu.memory_space<vmem>>, vector<8x36xf32>
    %cst = arith.constant dense<0.000000e+00> : vector<8x256xf32>
    %3 = tpu.matmul %2, %1, %cst {dimension_numbers = #tpu.dot_dimension_numbers<[1], [0], [0], [1], [0, 0, 1, 1], [], []>} : vector<8x36xf32>, vector<36x256xf32>, vector<8x256xf32> -> vector<8x256xf32>
    %c0_4 = arith.constant 0 : index
    %c0_5 = arith.constant 0 : index
    %4 = vector.load %arg6[%c0_4, %c0_5] : memref<8x1xf32, #tpu.memory_space<vmem>>, vector<8x1xf32>
    %5 = vector.broadcast %4 : vector<8x1xf32> to vector<8x256xf32>
    %6 = arith.addf %3, %5 : vector<8x256xf32>
    %c0_6 = arith.constant 0 : index
    %c0_7 = arith.constant 0 : index
    %7 = vector.load %arg5[%c0_6, %c0_7] : memref<8x36xf32, #tpu.memory_space<vmem>>, vector<8x36xf32>
    %8 = arith.mulf %1, %1 : vector<36x256xf32>
    %cst_8 = arith.constant dense<0.000000e+00> : vector<8x256xf32>
    %9 = tpu.matmul %7, %8, %cst_8 {dimension_numbers = #tpu.dot_dimension_numbers<[1], [0], [0], [1], [0, 0, 1, 1], [], []>} : vector<8x36xf32>, vector<36x256xf32>, vector<8x256xf32> -> vector<8x256xf32>
    %cst_9 = arith.constant 0.000000e+00 : f32
    %10 = vector.broadcast %cst_9 : f32 to vector<8x256xf32>
    %11 = arith.maximumf %9, %10 : vector<8x256xf32>
    %12 = math.sqrt %11 : vector<8x256xf32>
    %13 = tpu.iota {dimensions = array<i32: 0>} : vector<8x256xi32>
    %14 = tpu.iota {dimensions = array<i32: 1>} : vector<8x256xi32>
    %c256_i32 = arith.constant 256 : i32
    %15 = arith.muli %arg1, %c256_i32 : i32
    %16 = vector.broadcast %15 : i32 to vector<8x256xi32>
    %17 = arith.addi %14, %16 : vector<8x256xi32>
    %c8_i32 = arith.constant 8 : i32
    %18 = arith.muli %arg0, %c8_i32 : i32
    %19 = vector.broadcast %18 : i32 to vector<8x256xi32>
    %20 = arith.addi %19, %13 : vector<8x256xi32>
    %c256_i32_10 = arith.constant 256 : i32
    %21 = vector.broadcast %c256_i32_10 : i32 to vector<8x256xi32>
    %22 = arith.muli %20, %21 : vector<8x256xi32>
    %23 = arith.addi %22, %17 : vector<8x256xi32>
    %c0_11 = arith.constant 0 : index
    %24 = memref.load %arg2[%c0_11] : memref<1xi32, #tpu.memory_space<smem>>
    %c-1640531527_i32 = arith.constant -1640531527 : i32
    %25 = arith.muli %24, %c-1640531527_i32 : i32
    %26 = vector.broadcast %25 : i32 to vector<8x256xi32>
    %27 = arith.addi %23, %26 : vector<8x256xi32>
    %c16_i32 = arith.constant 16 : i32
    %28 = vector.broadcast %c16_i32 : i32 to vector<8x256xi32>
    %29 = arith.shrsi %27, %28 : vector<8x256xi32>
    %c65535_i32 = arith.constant 65535 : i32
    %30 = vector.broadcast %c65535_i32 : i32 to vector<8x256xi32>
    %31 = arith.andi %29, %30 : vector<8x256xi32>
    %32 = arith.xori %27, %31 : vector<8x256xi32>
    %c-2048144789_i32 = arith.constant -2048144789 : i32
    %33 = vector.broadcast %c-2048144789_i32 : i32 to vector<8x256xi32>
    %34 = arith.muli %32, %33 : vector<8x256xi32>
    %c13_i32 = arith.constant 13 : i32
    %35 = vector.broadcast %c13_i32 : i32 to vector<8x256xi32>
    %36 = arith.shrsi %34, %35 : vector<8x256xi32>
    %c524287_i32 = arith.constant 524287 : i32
    %37 = vector.broadcast %c524287_i32 : i32 to vector<8x256xi32>
    %38 = arith.andi %36, %37 : vector<8x256xi32>
    %39 = arith.xori %34, %38 : vector<8x256xi32>
    %c-1028477387_i32 = arith.constant -1028477387 : i32
    %40 = vector.broadcast %c-1028477387_i32 : i32 to vector<8x256xi32>
    %41 = arith.muli %39, %40 : vector<8x256xi32>
    %c16_i32_12 = arith.constant 16 : i32
    %42 = vector.broadcast %c16_i32_12 : i32 to vector<8x256xi32>
    %43 = arith.shrsi %41, %42 : vector<8x256xi32>
    %c65535_i32_13 = arith.constant 65535 : i32
    %44 = vector.broadcast %c65535_i32_13 : i32 to vector<8x256xi32>
    %45 = arith.andi %43, %44 : vector<8x256xi32>
    %46 = arith.xori %41, %45 : vector<8x256xi32>
    %c8388607_i32 = arith.constant 8388607 : i32
    %47 = vector.broadcast %c8388607_i32 : i32 to vector<8x256xi32>
    %48 = arith.andi %46, %47 : vector<8x256xi32>
    %49 = arith.sitofp %48 : vector<8x256xi32> to vector<8x256xf32>
    %cst_14 = arith.constant 1.1920929E-7 : f32
    %50 = vector.broadcast %cst_14 : f32 to vector<8x256xf32>
    %51 = arith.mulf %49, %50 : vector<8x256xf32>
    %52 = arith.mulf %51, %12 : vector<8x256xf32>
    %53 = arith.addf %6, %52 : vector<8x256xf32>
    %c0_15 = arith.constant 0 : index
    %c0_16 = arith.constant 0 : index
    %c0_17 = arith.constant 0 : index
    %54 = vector.load %arg7[%c0_15, %c0_16, %c0_17] : memref<1x8x256xf32, #tpu.memory_space<vmem>>, vector<1x8x256xf32>
    %55 = vector.shape_cast %54 : vector<1x8x256xf32> to vector<8x256xf32>
    %56 = vector.shape_cast %53 : vector<8x256xf32> to vector<1x8x256xf32>
    tpu.vector_store %arg7[%c0_15, %c0_16, %c0_17], %56 {strides = array<i32>} : memref<1x8x256xf32, #tpu.memory_space<vmem>>, vector<1x8x256xf32>,
    return
  }
  func.func @transform_0(%arg0: i32, %arg1: i32, %arg2: memref<1xi32, #tpu.memory_space<smem>>) -> (i32, i32, i32) {
    %c0_i32 = arith.constant 0 : i32
    %c0_i32_0 = arith.constant 0 : i32
    return %arg0, %c0_i32, %arg1 : i32, i32, i32
  }
  func.func @transform_1(%arg0: i32, %arg1: i32, %arg2: memref<1xi32, #tpu.memory_space<smem>>) -> (i32, i32) {
    %c0_i32 = arith.constant 0 : i32
    %c0_i32_0 = arith.constant 0 : i32
    %c0_i32_1 = arith.constant 0 : i32
    return %c0_i32, %c0_i32_0 : i32, i32
  }
  func.func @transform_2(%arg0: i32, %arg1: i32, %arg2: memref<1xi32, #tpu.memory_space<smem>>) -> (i32, i32) {
    %c0_i32 = arith.constant 0 : i32
    %c0_i32_0 = arith.constant 0 : i32
    %c0_i32_1 = arith.constant 0 : i32
    return %c0_i32, %c0_i32_0 : i32, i32
  }
  func.func @transform_3(%arg0: i32, %arg1: i32, %arg2: memref<1xi32, #tpu.memory_space<smem>>) -> (i32, i32) {
    %c0_i32 = arith.constant 0 : i32
    %c0_i32_0 = arith.constant 0 : i32
    %c0_i32_1 = arith.constant 0 : i32
    return %c0_i32, %c0_i32_0 : i32, i32
  }
  func.func @transform_4(%arg0: i32, %arg1: i32, %arg2: memref<1xi32, #tpu.memory_space<smem>>) -> (i32, i32, i32) {
    %c0_i32 = arith.constant 0 : i32
    %c0_i32_0 = arith.constant 0 : i32
    return %arg0, %c0_i32, %arg1 : i32, i32, i32
  }
}

</mosaic_0001>

<bundles_post_ra>
// kernel: my_new_conv2d_forward.1
= control target key start
LH: loop header
LB: loop body
LE: loop exit
PB: predicated region body
PF: predicated region fallthrough
CT: control target
= control target key end

     0   :  { %s649_s20 = smov 0   ;;  %s651_s21 = smov 0   ;;  %s700_s0 = inlined_call_operand.<no memory space> [shape: s32[1], index: 0, kind: input, shape index: {}]   ;;  %s701_s1 = inlined_call_operand.vmem [shape: f32[2,36,256], index: 1, kind: input, shape index: {}]   ;;  %s702_s2 = inlined_call_operand.vmem [shape: f32[8,36], index: 2, kind: input, shape index: {}]   ;;  %s703_s3 = inlined_call_operand.vmem [shape: f32[8,36], index: 3, kind: input, shape index: {}]   ;;  %s704_s4 = inlined_call_operand.vmem [shape: f32[8,1], index: 4, kind: input, shape index: {}]   ;;  %s705_s5 = inlined_call_operand.vmem [shape: f32[2,8,256], index: 5, kind: output, shape index: {}]  }
   0x1   :  { %10 = sst [smem:[#allocation3]] %s700_s0  ;;  %s653_s22 = smov 0  }
   0x2 LB: > { %s28_s0 = sadd.s32 1, %s609_s21  ;;  %p538_p0 = scmp.ge.s32.totalorder %s613_s22, 1  ;;  %s613_s22 = sphi %s653_s22, %s16_s22   ;;  %s609_s21 = sphi %s651_s21, %s707_s21   ;;  %s605_s20 = sphi %s649_s20, %s706_s20  }
   0x3   : > { %p30_p1 = scmp.ge.s32.totalorder %s28_s0, 2  ;;  %p185_p2 = scmp.lt.s32.totalorder %s613_s22, 3 }
   0x5   : > { %s709_s0 = smov (%p30_p1, %s28_s0), 0  ;;  %p186_p3 = pnand %p538_p0, %p185_p2 }
   0x6   : > { %p220_p4 = scmp.lt.s32.totalorder (!%p186_p3), %s605_s20, 1  ;;  %s550_s9 = sshll.u32 (!%p186_p3), %s605_s20, 3 }
   0x7   : > { %189 = sbr.rel (%p186_p3) target bundleno = 190 (0xbe), region = 36  ;;  %s408_s10 = sld [smem:[#allocation3]] (!%p186_p3) }
   0xc   : > { %v615_v0 = vmov 0   ;;  %v250_v1 = vld [vmem:[%s704_s4] sm:$0xff]  ;;  %s674_s25 = scalar_select %p220_p4, %s605_s20, 1  ;;  %vm260_vm0 = vcmask 1043456   ;;  %vm256_vm1 = vcmask 293888   ;;  %v393_v24 = vlaneseq }
   0xd   : > { %586 = vset.pattern.permute.xlu0 %v615_v0  ;;  %v307_v22 = vld [vmem:[%s703_s3] sm:$0xff]  ;;  %v403_v26 = vstv %s550_s9  ;;  %s409_s11 = smul.u32 2654435769, %s408_s10 }
   0xe   : > { %253 = vperm.xlu0 %586, %v250_v1   ;;  %s560_s26 = smul.u32 80, %s674_s25  ;;  %v249_v23 = vld [vmem:[%s702_s2] sm:$0xff]  ;;  %v394_v25 = vshrl.u32 %v393_v24, 7  ;;  %v396_v27 = vand.u32 127, %v393_v24  ;;  %s559_s12 = sshll.u32 %s674_s25, 4 }
   0xf   : > { %v410_v33 = vstv %s409_s11  ;;  %s237_s15 = scalar_lea.vmem %s705_s5, %s559_s12 }
  0x10   : > { %s227_s29 = scalar_lea.vmem %s701_s1, %s560_s26  ;;  %v404_v28 = vadd.s32 %v403_v26, %v394_v25  ;;  %v397_v30 = vadd.s32 128, %v396_v27 }
  0x11   : > { %v247_v2 = vld [vmem:[%s227_s29 + $0x40] sm:$0xf]  ;;  %v248_v3 = vld [vmem:[%s227_s29 + $0x48] sm:$0xf]  ;;  %v245_v4 = vld [vmem:[%s227_s29 + $0x30] sm:$0xff] }
  0x12   : > { %v316_v5 = vmul.f32 %v247_v2, %v247_v2  ;;  %v317_v6 = vmul.f32 %v248_v3, %v248_v3  ;;  %v314_v7 = vmul.f32 %v245_v4, %v245_v4  ;;  %v246_v8 = vld [vmem:[%s227_s29 + $0x38] sm:$0xff]  ;;  %v243_v9 = vld [vmem:[%s227_s29 + $0x20] sm:$0xff]  ;;  %v244_v10 = vld [vmem:[%s227_s29 + $0x28] sm:$0xff]  ;;  %542 = vmatpush.msk.msra.mxu0 %vm260_vm0, %v247_v2  ;;  %544 = vmatpush.msk.msra.mxu1 %vm260_vm0, %v248_v3  ;;  %v405_v29 = vmul.u32 256, %v404_v28 }
  0x13   : > { %v315_v11 = vmul.f32 %v246_v8, %v246_v8  ;;  %v241_v12 = vld [vmem:[%s227_s29 + $0x10] sm:$0xff]  ;;  %v242_v13 = vld [vmem:[%s227_s29 + $0x18] sm:$0xff]  ;;  %v312_v14 = vmul.f32 %v243_v9, %v243_v9  ;;  %v313_v15 = vmul.f32 %v244_v10, %v244_v10  ;;  %v239_v16 = vld [vmem:[%s227_s29] sm:$0xff] }
  0x14   : > { %546 = vmatpush.msk.msra.mxu2 %vm260_vm0, %v316_v5  ;;  %548 = vmatpush.msk.msra.mxu3 %vm260_vm0, %v317_v6  ;;  %v240_v17 = vld [vmem:[%s227_s29 + $0x8] sm:$0xff]  ;;  %v310_v18 = vmul.f32 %v241_v12, %v241_v12  ;;  %v311_v19 = vmul.f32 %v242_v13, %v242_v13  ;;  %v308_v20 = vmul.f32 %v239_v16, %v239_v16 }
  0x15   : > { %279 = vmatpush.msra.mxu0 %v245_v4  ;;  %299 = vmatpush.msra.mxu1 %v246_v8  ;;  %v309_v21 = vmul.f32 %v240_v17, %v240_v17  ;;  %v406_v31 = vadd.s32 %v405_v29, %v396_v27  ;;  %v407_v32 = vadd.s32 %v405_v29, %v397_v30 }
  0x16   : > { %339 = vmatpush.msra.mxu2 %v314_v7  ;;  %359 = vmatpush.msra.mxu3 %v315_v11 }
  0x17   : > { %280 = vmatpush.msra.mxu0 %v243_v9  ;;  %300 = vmatpush.msra.mxu1 %v244_v10  ;;  %v411_v34 = vadd.s32 %v410_v33, %v406_v31  ;;  %v412_v35 = vadd.s32 %v410_v33, %v407_v32 }
  0x18   : > { %340 = vmatpush.msra.mxu2 %v312_v14  ;;  %360 = vmatpush.msra.mxu3 %v313_v15 }
  0x19   : > { %281 = vmatpush.msra.mxu0 %v241_v12  ;;  %301 = vmatpush.msra.mxu1 %v242_v13  ;;  %v551_v36 = vshrl.u32 %v411_v34, 16  ;;  %v552_v37 = vshrl.u32 %v412_v35, 16 }
  0x1a   : > { %341 = vmatpush.msra.mxu2 %v310_v18  ;;  %361 = vmatpush.msra.mxu3 %v311_v19 }
  0x1b   : > { %282 = vmatpush.msra.mxu0 %v239_v16  ;;  %302 = vmatpush.msra.mxu1 %v240_v17  ;;  %v417_v38 = vxor.u32 %v551_v36, %v411_v34  ;;  %v418_v39 = vxor.u32 %v552_v37, %v412_v35 }
  0x1c   : > { %342 = vmatpush.msra.mxu2 %v308_v20  ;;  %362 = vmatpush.msra.mxu3 %v309_v21 }
  0x1d   : > { %547 = vmatmul.msk.f32.vlgmr.msra.gmra.mxu2 %vm256_vm1, %v307_v22  ;;  %549 = vmatmul.msk.f32.vlgmr.msra.gmra.mxu3 %vm256_vm1, %v307_v22  ;;  %v419_v40 = vmul.u32 2246822507, %v417_v38  ;;  %v420_v41 = vmul.u32 2246822507, %v418_v39 }
  0x1e   : > { %543 = vmatmul.msk.f32.vlgmr.msra.gmra.mxu0 %vm256_vm1, %v249_v23  ;;  %545 = vmatmul.msk.f32.vlgmr.msra.gmra.mxu1 %vm256_vm1, %v249_v23 }
  0x1f   : > { %v553_v42 = vshrl.u32 %v419_v40, 13  ;;  %v554_v43 = vshrl.u32 %v420_v41, 13 }
  0x21   : > { %v425_v44 = vxor.u32 %v553_v42, %v419_v40  ;;  %v426_v45 = vxor.u32 %v554_v43, %v420_v41 }
  0x23   : > { %v427_v48 = vmul.u32 3266489909, %v425_v44  ;;  %v428_v49 = vmul.u32 3266489909, %v426_v45 }
  0x25   : > { %v555_v52 = vshrl.u32 %v427_v48, 16  ;;  %v556_v53 = vshrl.u32 %v428_v49, 16 }
  0x27   : > { %v433_v54 = vxor.u32 %v555_v52, %v427_v48  ;;  %v434_v55 = vxor.u32 %v556_v53, %v428_v49 }
  0x29   : > { %v435_v61 = vand.u32 8388607, %v433_v54  ;;  %v436_v62 = vand.u32 8388607, %v434_v55 }
  0x2b   : > { %v437_v3 = vcvt.s32.f32 %v435_v61  ;;  %v438_v4 = vcvt.s32.f32 %v436_v62 }
  0x2d   : > { %v439_v11 = vmul.f32 1.1920929e-07, %v437_v3  ;;  %v440_v13 = vmul.f32 1.1920929e-07, %v438_v4 }
  0x80   : > { %v254_v6 = vpop.permute.xlu0 %253 }
  0x9b   : > { %v284_v7 = vpop.f32.mrf.mxu0  ;;  %v304_v12 = vpop.f32.mrf.mxu1 }
  0x9c   : > { %v285_v14 = vadd.f32 %v284_v7, %v254_v6  ;;  %v305_v20 = vadd.f32 %v304_v12, %v254_v6 }
  0xa0   : > { %v344_v46 = vpop.f32.mrf.mxu2  ;;  %v364_v47 = vpop.f32.mrf.mxu3 }
  0xa1   : > { %v367_v50 = vmax.f32 %v344_v46, 0.0  ;;  %v368_v51 = vmax.f32 %v364_v47, 0.0 }
  0xa3   : > { %587 = vrsqrt.f32 %v367_v50  ;;  %vm376_vm2 = vcmp.eq.f32.partialorder %v367_v50, inf  ;;  %v379_v15 = vand.u32 2147483648, %v367_v50  ;;  %vm378_vm3 = vcmp.eq.f32.partialorder %v367_v50, 0.0 }
  0xa4   : > { %589 = vrsqrt.f32 %v368_v51  ;;  %vm388_vm4 = vcmp.eq.f32.partialorder %v368_v51, inf  ;;  %v391_v18 = vand.u32 2147483648, %v368_v51  ;;  %vm390_vm5 = vcmp.eq.f32.partialorder %v368_v51, 0.0 }
  0xa9   : > { %v588_v56 = vpop.eup %587 }
  0xaa   : > { %v590_v57 = vpop.eup %589  ;;  %v370_v58 = vmul.f32 %v588_v56, %v367_v50 }
  0xab   : > { %v382_v59 = vmul.f32 %v590_v57, %v368_v51 }
  0xac   : > { %v371_v60 = vmul.f32 %v588_v56, %v370_v58 }
  0xad   : > { %v383_v63 = vmul.f32 %v590_v57, %v382_v59 }
  0xae   : > { %v372_v0 = vmul.f32 0.5, %v371_v60 }
  0xaf   : > { %v384_v1 = vmul.f32 0.5, %v383_v63 }
  0xb0   : > { %v373_v2 = vsub.f32 1.5, %v372_v0 }
  0xb1   : > { %v385_v5 = vsub.f32 1.5, %v384_v1 }
  0xb2   : > { %v374_v8 = vmul.f32 %v588_v56, %v373_v2 }
  0xb3   : > { %v386_v9 = vmul.f32 %v590_v57, %v385_v5 }
  0xb4   : > { %v375_v10 = vmul.f32 %v374_v8, %v367_v50 }
  0xb5   : > { %v387_v16 = vmul.f32 %v386_v9, %v368_v51 }
  0xb6   : > { %v377_v17 = vsel %vm376_vm2, %v367_v50, %v375_v10 }
  0xb7   : > { %v380_v19 = vsel %vm378_vm3, %v379_v15, %v377_v17  ;;  %v389_v21 = vsel %vm388_vm4, %v368_v51, %v387_v16 }
  0xb8   : > { %v441_v22 = vmul.f32 %v439_v11, %v380_v19  ;;  %v392_v23 = vsel %vm390_vm5, %v391_v18, %v389_v21 }
  0xb9   : > { %v442_v24 = vmul.f32 %v440_v13, %v392_v23 }
  0xba   : > { %v443_v25 = vadd.f32 %v441_v22, %v285_v14 }
  0xbb   : > { %v444_v26 = vadd.f32 %v442_v24, %v305_v20 }
  0xbc   : > { %445 = vst [vmem:[%s237_s15] sm:$0xff] %v443_v25 }
  0xbd   : > { %446 = vst [vmem:[%s237_s15 + $0x8] sm:$0xff] %v444_v26 }
  0xbe PF: > { %s16_s22 = sadd.s32 1, %s613_s22   ;;  %s706_s20 = smov %s609_s21 }
  0xbf   : > { %p13_p5 = scmp.ge.s32.totalorder %s16_s22, 4   ;;  %s707_s21 = smov %s709_s0 }
  0xc1   :  { %15 = sbr.rel (!%p13_p5) target bundleno = 2 (0x2), region = 66 }

</bundles_post_ra>
